<compile_context>
chip_gen: v7x
topology: tpu7x:2x2x1
jax: 0.10.0
libtpu: 0.0.40
codegen_flags: <defaults>
</compile_context>

<pallas_src>
import functools

import jax
import jax.numpy as jnp
from jax import lax
from jax.experimental import pallas as pl
from jax.experimental.pallas import tpu as pltpu


def _vmem_capacity_bytes():
    try:
        return int(pltpu.get_tpu_info().vmem_capacity_bytes)
    except Exception:
        return 64 * 1024 * 1024  # v7x-safe fallback


def _pick_tile_n(n, c, itemsize):
    """Rows per grid step: ~8 MiB of pred+proba HBM traffic, VMEM-capped."""
    byte_budget = 8 * 1024 * 1024
    tile = byte_budget // max(1, 2 * c * itemsize)
    # VMEM per row: pred+proba double-buffered blocks + ~6 live f32 (T, C)
    # temporaries (x, ex, softmax, diff, sq, select).
    per_row = 2 * 2 * c * itemsize + 6 * c * 4
    vmem_budget = _vmem_capacity_bytes() // 3
    tile = min(tile, max(8, vmem_budget // per_row))
    return max(8, (tile // 8) * 8)


def _loss_exp_kernel(pred_ref, truth_ref, proba_ref, ce_out_ref, mse_out_ref,
                     ce_acc, mse_acc, *, n_total, tile_n, tiles_per_core,
                     need_mask):
    # pred_ref  : (T, C)       VMEM (any float dtype; cast here)
    # truth_ref : (T, 1) i32   VMEM (class indices)
    # proba_ref : (T, C)       VMEM
    # ce_out_ref/mse_out_ref : (1, 1, 1) f32 VMEM (per-core partial sums)
    # ce_acc    : (T, 1) f32   VMEM scratch
    # mse_acc   : (1, C) f32   VMEM scratch
    core = pl.program_id(0)     # "parallel" axis (2 TensorCores on v7x)
    i = pl.program_id(1)        # "arbitrary" reduction axis within the core

    @pl.when(i == 0)
    def _init():
        ce_acc[...] = jnp.zeros_like(ce_acc)
        mse_acc[...] = jnp.zeros_like(mse_acc)

    x = pred_ref[...].astype(jnp.float32)                 # (T, C)
    t, c = x.shape

    # numerically-stable softmax pieces along the class axis (dim=1)
    m = jnp.max(x, axis=1, keepdims=True)                 # (T, 1)
    ex = jnp.exp(x - m)                                   # (T, C)
    se = jnp.sum(ex, axis=1, keepdims=True)               # (T, 1)
    softmax = ex * pl.reciprocal(se, approx=False)        # (T, C), EUP recip

    # CrossEntropy per row without a one-hot f32 temporary:
    #   CE_i = log(se_i) + m_i - x[i, truth_i]
    col = lax.broadcasted_iota(jnp.int32, (1, c), 1)      # (1, C)
    x_t = jnp.sum(jnp.where(col == truth_ref[...], x, 0.0),
                  axis=1, keepdims=True)                  # (T, 1)
    ce_rows = jnp.log(se) + m - x_t                       # (T, 1)

    diff = softmax - proba_ref[...].astype(jnp.float32)   # (T, C)
    sq = diff * diff                                      # (T, C)

    if need_mask:
        # Only the last (partial) tile and the clamped duplicate tail tile of
        # core 1 ever contain invalid rows; masking is skipped statically
        # otherwise.  NaN/Inf garbage in padded rows is discarded by the
        # selects below.
        tile_idx = core * tiles_per_core + i
        row = tile_idx * tile_n + lax.broadcasted_iota(jnp.int32, (t, 1), 0)
        valid = row < n_total                              # (T, 1)
        ce_rows = jnp.where(valid, ce_rows, 0.0)
        sq = jnp.where(valid, sq, 0.0)

    # vreg-friendly accumulators: no per-tile reduce-to-scalar RMW.
    ce_acc[...] += ce_rows                                 # (T, 1)
    mse_acc[...] += jnp.sum(sq, axis=0, keepdims=True)     # (1, C)

    @pl.when(i == pl.num_programs(1) - 1)
    def _finalize():
        ce_out_ref[...] = jnp.sum(ce_acc[...]).reshape(1, 1, 1)
        mse_out_ref[...] = jnp.sum(mse_acc[...]).reshape(1, 1, 1)


def loss_exp(pred, truth, proba, beta, *, tile_n=None):
    """pred: (N, C) float logits, truth: (N,) int class indices,
    proba: (N, C) float target probabilities, beta: scalar."""
    n, c = pred.shape
    itemsize = max(jnp.dtype(pred.dtype).itemsize,
                   jnp.dtype(proba.dtype).itemsize)
    if tile_n is None:
        tile_n = _pick_tile_n(n, c, itemsize)
    if tile_n >= n:
        tile_n = n                                 # single full-extent tile
    else:
        tile_n = max(8, (tile_n // 8) * 8)         # sublane multiple of 8
    grid_n = pl.cdiv(n, tile_n)                    # total batch tiles
    tiles_per_core = pl.cdiv(grid_n, 2)            # split across 2 TCs (v7x)
    need_mask = (2 * tiles_per_core * tile_n != n)

    last_block = grid_n - 1
    if 2 * tiles_per_core == grid_n:
        def block_row(core, i):
            return core * tiles_per_core + i
    else:
        def block_row(core, i):                    # clamp duplicated tail tile
            return jnp.minimum(core * tiles_per_core + i, last_block)

    in_map = lambda core, i: (block_row(core, i), 0)
    out_map = lambda core, i: (core, 0, 0)

    truth2d = truth.astype(jnp.int32).reshape(n, 1)
    kernel = functools.partial(_loss_exp_kernel, n_total=n, tile_n=tile_n,
                               tiles_per_core=tiles_per_core,
                               need_mask=need_mask)

    vmem_cap = _vmem_capacity_bytes()
    vmem_limit = int(min(vmem_cap * 3 // 4, 64 * 1024 * 1024))

    ce_parts, mse_parts = pl.pallas_call(
        kernel,
        out_shape=(jax.ShapeDtypeStruct((2, 1, 1), jnp.float32),
                   jax.ShapeDtypeStruct((2, 1, 1), jnp.float32)),
        grid_spec=pltpu.PrefetchScalarGridSpec(
            num_scalar_prefetch=0,
            grid=(2, tiles_per_core),
            in_specs=[
                pl.BlockSpec((tile_n, c), in_map),     # pred
                pl.BlockSpec((tile_n, 1), in_map),     # truth (class indices)
                pl.BlockSpec((tile_n, c), in_map),     # proba
            ],
            out_specs=(pl.BlockSpec((1, 1, 1), out_map),
                       pl.BlockSpec((1, 1, 1), out_map)),
            scratch_shapes=[pltpu.VMEM((tile_n, 1), jnp.float32),   # ce_acc
                            pltpu.VMEM((1, c), jnp.float32)],       # mse_acc
        ),
        compiler_params=pltpu.CompilerParams(
            dimension_semantics=("parallel", "arbitrary"),
            vmem_limit_bytes=vmem_limit,
        ),
    )(pred, truth2d, proba)

    # finalize in the wrapper: mean, *beta, exp(-loss)
    ce = jnp.sum(ce_parts) / jnp.float32(n)
    mse = jnp.sum(mse_parts) / jnp.float32(n * c)
    loss = ce + mse * jnp.asarray(beta, jnp.float32)
    return jnp.exp(-loss)


def _loss_exp_ref(pred, truth, proba, beta):
    # pure-JAX reference (mirrors the PyTorch module)
    logp = jax.nn.log_softmax(pred.astype(jnp.float32), axis=1)
    ce = -jnp.mean(jnp.take_along_axis(logp, truth[:, None].astype(jnp.int32), axis=1))
    p = jax.nn.softmax(pred.astype(jnp.float32), axis=1)
    mse = jnp.mean((p - proba.astype(jnp.float32)) ** 2)
    return jnp.exp(-(ce + mse * beta))


if __name__ == "__main__":
    key = jax.random.PRNGKey(0)

    # --- small case consistent with the module: batch=8, classes=32 ---
    N, C = 8, 32
    k1, k2, k3 = jax.random.split(key, 3)
    pred = jax.random.normal(k1, (N, C), dtype=jnp.float32)
    truth = jax.random.randint(k2, (N,), 0, C, dtype=jnp.int32)
    proba = jax.nn.softmax(jax.random.normal(k3, (N, C), dtype=jnp.float32), axis=1)
    beta = 0.7

    out = jax.block_until_ready(loss_exp(pred, truth, proba, beta))
    ref = _loss_exp_ref(pred, truth, proba, jnp.float32(beta))
    assert jnp.allclose(out, ref, rtol=1e-5, atol=1e-5), (out, ref)

    # --- exercise the 2-core split, remainder tile and clamped duplicate tile ---
    N2, C2 = 300, 128
    k4, k5, k6 = jax.random.split(jax.random.PRNGKey(1), 3)
    pred2 = jax.random.normal(k4, (N2, C2), dtype=jnp.float32)
    truth2 = jax.random.randint(k5, (N2,), 0, C2, dtype=jnp.int32)
    proba2 = jax.nn.softmax(jax.random.normal(k6, (N2, C2), dtype=jnp.float32), axis=1)

    out2 = jax.block_until_ready(loss_exp(pred2, truth2, proba2, beta, tile_n=128))
    ref2 = _loss_exp_ref(pred2, truth2, proba2, jnp.float32(beta))
    assert jnp.allclose(out2, ref2, rtol=1e-5, atol=1e-5), (out2, ref2)

    print("KERNEL_OK")
</pallas_src>

<mosaic_0001>
module attributes {stable_mosaic.version = 11 : i64} {
  func.func @_loss_exp_kernel(%arg0: i32, %arg1: i32, %arg2: memref<8x32xf32, #tpu.memory_space<vmem>>, %arg3: memref<8x1xi32, #tpu.memory_space<vmem>>, %arg4: memref<8x32xf32, #tpu.memory_space<vmem>>, %arg5: memref<1x1x1xf32, #tpu.memory_space<vmem>>, %arg6: memref<1x1x1xf32, #tpu.memory_space<vmem>>, %arg7: memref<8x1xf32, #tpu.memory_space<vmem>>, %arg8: memref<1x32xf32, #tpu.memory_space<vmem>>) attributes {dimension_semantics = [#tpu.dimension_semantics<parallel>, #tpu.dimension_semantics<arbitrary>], iteration_bounds = array<i64: 2, 1>, scalar_prefetch = 0 : i64, scratch_operands = 2 : i64, tpu.core_type = #tpu.core_type<tc>, window_params = [{transform_indices = @transform_0, window_bounds = array<i64: 8, 32>}, {transform_indices = @transform_1, window_bounds = array<i64: 8, 1>}, {transform_indices = @transform_2, window_bounds = array<i64: 8, 32>}, {transform_indices = @transform_3, window_bounds = array<i64: 1, 1, 1>}, {transform_indices = @transform_4, window_bounds = array<i64: 1, 1, 1>}]} {
    %c0_i32 = arith.constant 0 : i32
    %0 = arith.cmpi eq, %arg1, %c0_i32 : i32
    %1 = arith.extui %0 : i1 to i32
    %c0_i32_0 = arith.constant 0 : i32
    %2 = arith.cmpi ne, %1, %c0_i32_0 : i32
    scf.if %2 {
      %cst_23 = arith.constant 0.000000e+00 : f32
      %54 = vector.broadcast %cst_23 : f32 to vector<8x1xf32>
      %c0_24 = arith.constant 0 : index
      %c0_25 = arith.constant 0 : index
      %55 = vector.load %arg7[%c0_24, %c0_25] : memref<8x1xf32, #tpu.memory_space<vmem>>, vector<8x1xf32>
      tpu.vector_store %arg7[%c0_24, %c0_25], %54 {strides = array<i32>} : memref<8x1xf32, #tpu.memory_space<vmem>>, vector<8x1xf32>,
      %cst_26 = arith.constant 0.000000e+00 : f32
      %56 = vector.broadcast %cst_26 : f32 to vector<1x32xf32>
      %c0_27 = arith.constant 0 : index
      %c0_28 = arith.constant 0 : index
      %57 = vector.load %arg8[%c0_27, %c0_28] : memref<1x32xf32, #tpu.memory_space<vmem>>, vector<1x32xf32>
      tpu.vector_store %arg8[%c0_27, %c0_28], %56 {strides = array<i32>} : memref<1x32xf32, #tpu.memory_space<vmem>>, vector<1x32xf32>,
    } else {
    }
    %c0 = arith.constant 0 : index
    %c0_1 = arith.constant 0 : index
    %3 = vector.load %arg2[%c0, %c0_1] : memref<8x32xf32, #tpu.memory_space<vmem>>, vector<8x32xf32>
    %cst = arith.constant dense<0xFF800000> : vector<8xf32>
    %4 = vector.multi_reduction <maximumf>, %3, %cst [1] : vector<8x32xf32> to vector<8xf32>
    %5 = vector.shape_cast %4 : vector<8xf32> to vector<8x1xf32>
    %6 = vector.broadcast %5 : vector<8x1xf32> to vector<8x32xf32>
    %7 = arith.subf %3, %6 : vector<8x32xf32>
    %8 = math.exp %7 : vector<8x32xf32>
    %cst_2 = arith.constant dense<0.000000e+00> : vector<8xf32>
    %9 = vector.multi_reduction <add>, %8, %cst_2 [1] : vector<8x32xf32> to vector<8xf32>
    %10 = vector.shape_cast %9 : vector<8xf32> to vector<8x1xf32>
    %11 = tpu.reciprocal %10 : vector<8x1xf32> -> vector<8x1xf32>
    %12 = vector.broadcast %11 : vector<8x1xf32> to vector<8x32xf32>
    %13 = arith.mulf %8, %12 : vector<8x32xf32>
    %14 = tpu.iota {dimensions = array<i32: 1>} : vector<1x32xi32>
    %c0_3 = arith.constant 0 : index
    %c0_4 = arith.constant 0 : index
    %15 = vector.load %arg3[%c0_3, %c0_4] : memref<8x1xi32, #tpu.memory_space<vmem>>, vector<8x1xi32>
    %16 = vector.broadcast %14 : vector<1x32xi32> to vector<8x32xi32>
    %17 = vector.broadcast %15 : vector<8x1xi32> to vector<8x32xi32>
    %18 = arith.cmpi eq, %16, %17 : vector<8x32xi32>
    %cst_5 = arith.constant 0.000000e+00 : f32
    %19 = vector.broadcast %cst_5 : f32 to vector<8x32xf32>
    %20 = arith.select %18, %3, %19 : vector<8x32xi1>, vector<8x32xf32>
    %cst_6 = arith.constant dense<0.000000e+00> : vector<8xf32>
    %21 = vector.multi_reduction <add>, %20, %cst_6 [1] : vector<8x32xf32> to vector<8xf32>
    %22 = vector.shape_cast %21 : vector<8xf32> to vector<8x1xf32>
    %23 = math.log %10 : vector<8x1xf32>
    %24 = arith.addf %23, %5 : vector<8x1xf32>
    %25 = arith.subf %24, %22 : vector<8x1xf32>
    %c0_7 = arith.constant 0 : index
    %c0_8 = arith.constant 0 : index
    %26 = vector.load %arg4[%c0_7, %c0_8] : memref<8x32xf32, #tpu.memory_space<vmem>>, vector<8x32xf32>
    %27 = arith.subf %13, %26 : vector<8x32xf32>
    %28 = arith.mulf %27, %27 : vector<8x32xf32>
    %c1_i32 = arith.constant 1 : i32
    %29 = arith.muli %arg0, %c1_i32 : i32
    %30 = arith.addi %29, %arg1 : i32
    %c8_i32 = arith.constant 8 : i32
    %31 = arith.muli %30, %c8_i32 : i32
    %32 = tpu.iota {dimensions = array<i32: 0>} : vector<8x1xi32>
    %33 = vector.broadcast %31 : i32 to vector<8x1xi32>
    %34 = arith.addi %33, %32 : vector<8x1xi32>
    %c8_i32_9 = arith.constant 8 : i32
    %35 = vector.broadcast %c8_i32_9 : i32 to vector<8x1xi32>
    %36 = arith.cmpi slt, %34, %35 : vector<8x1xi32>
    %cst_10 = arith.constant 0.000000e+00 : f32
    %37 = vector.broadcast %cst_10 : f32 to vector<8x1xf32>
    %38 = arith.select %36, %25, %37 : vector<8x1xi1>, vector<8x1xf32>
    %cst_11 = arith.constant 0.000000e+00 : f32
    %39 = vector.shape_cast %36 : vector<8x1xi1> to vector<8x1xi1>
    %40 = vector.broadcast %39 : vector<8x1xi1> to vector<8x32xi1>
    %41 = vector.broadcast %cst_11 : f32 to vector<8x32xf32>
    %42 = arith.select %40, %28, %41 : vector<8x32xi1>, vector<8x32xf32>
    %c0_12 = arith.constant 0 : index
    %c0_13 = arith.constant 0 : index
    %43 = vector.load %arg7[%c0_12, %c0_13] : memref<8x1xf32, #tpu.memory_space<vmem>>, vector<8x1xf32>
    %44 = arith.addf %43, %38 : vector<8x1xf32>
    %c0_14 = arith.constant 0 : index
    %c0_15 = arith.constant 0 : index
    %45 = vector.load %arg7[%c0_14, %c0_15] : memref<8x1xf32, #tpu.memory_space<vmem>>, vector<8x1xf32>
    tpu.vector_store %arg7[%c0_14, %c0_15], %44 {strides = array<i32>} : memref<8x1xf32, #tpu.memory_space<vmem>>, vector<8x1xf32>,
    %c0_16 = arith.constant 0 : index
    %c0_17 = arith.constant 0 : index
    %46 = vector.load %arg8[%c0_16, %c0_17] : memref<1x32xf32, #tpu.memory_space<vmem>>, vector<1x32xf32>
    %cst_18 = arith.constant dense<0.000000e+00> : vector<32xf32>
    %47 = vector.multi_reduction <add>, %42, %cst_18 [0] : vector<8x32xf32> to vector<32xf32>
    %48 = vector.shape_cast %47 : vector<32xf32> to vector<1x32xf32>
    %49 = arith.addf %46, %48 : vector<1x32xf32>
    %c0_19 = arith.constant 0 : index
    %c0_20 = arith.constant 0 : index
    %50 = vector.load %arg8[%c0_19, %c0_20] : memref<1x32xf32, #tpu.memory_space<vmem>>, vector<1x32xf32>
    tpu.vector_store %arg8[%c0_19, %c0_20], %49 {strides = array<i32>} : memref<1x32xf32, #tpu.memory_space<vmem>>, vector<1x32xf32>,
    %c0_i32_21 = arith.constant 0 : i32
    %51 = arith.cmpi eq, %arg1, %c0_i32_21 : i32
    %52 = arith.extui %51 : i1 to i32
    %c0_i32_22 = arith.constant 0 : i32
    %53 = arith.cmpi ne, %52, %c0_i32_22 : i32
    scf.if %53 {
      %c0_23 = arith.constant 0 : index
      %c0_24 = arith.constant 0 : index
      %54 = vector.load %arg7[%c0_23, %c0_24] : memref<8x1xf32, #tpu.memory_space<vmem>>, vector<8x1xf32>
      %55 = vector.shape_cast %54 : vector<8x1xf32> to vector<1x8x1xf32>
      %cst_25 = arith.constant dense<0.000000e+00> : vector<1xf32>
      %56 = vector.multi_reduction <add>, %55, %cst_25 [1, 2] : vector<1x8x1xf32> to vector<1xf32>
      %57 = vector.shape_cast %56 : vector<1xf32> to vector<1x1x1xf32>
      %58 = vector.extract %57[0, 0, 0] : f32 from vector<1x1x1xf32>
      %59 = vector.broadcast %58 : f32 to vector<1x1x1xf32>
      %c0_26 = arith.constant 0 : index
      %c0_27 = arith.constant 0 : index
      %c0_28 = arith.constant 0 : index
      %60 = vector.load %arg5[%c0_26, %c0_27, %c0_28] : memref<1x1x1xf32, #tpu.memory_space<vmem>>, vector<1x1x1xf32>
      tpu.vector_store %arg5[%c0_26, %c0_27, %c0_28], %59 {strides = array<i32>} : memref<1x1x1xf32, #tpu.memory_space<vmem>>, vector<1x1x1xf32>,
      %c0_29 = arith.constant 0 : index
      %c0_30 = arith.constant 0 : index
      %61 = vector.load %arg8[%c0_29, %c0_30] : memref<1x32xf32, #tpu.memory_space<vmem>>, vector<1x32xf32>
      %62 = vector.shape_cast %61 : vector<1x32xf32> to vector<1x1x32xf32>
      %cst_31 = arith.constant dense<0.000000e+00> : vector<1xf32>
      %63 = vector.multi_reduction <add>, %62, %cst_31 [1, 2] : vector<1x1x32xf32> to vector<1xf32>
      %64 = vector.shape_cast %63 : vector<1xf32> to vector<1x1x1xf32>
      %65 = vector.extract %64[0, 0, 0] : f32 from vector<1x1x1xf32>
      %66 = vector.broadcast %65 : f32 to vector<1x1x1xf32>
      %c0_32 = arith.constant 0 : index
      %c0_33 = arith.constant 0 : index
      %c0_34 = arith.constant 0 : index
      %67 = vector.load %arg6[%c0_32, %c0_33, %c0_34] : memref<1x1x1xf32, #tpu.memory_space<vmem>>, vector<1x1x1xf32>
      tpu.vector_store %arg6[%c0_32, %c0_33, %c0_34], %66 {strides = array<i32>} : memref<1x1x1xf32, #tpu.memory_space<vmem>>, vector<1x1x1xf32>,
    } else {
    }
    return
  }
  func.func @transform_0(%arg0: i32, %arg1: i32) -> (i32, i32) {
    %c1_i32 = arith.constant 1 : i32
    %0 = arith.muli %arg0, %c1_i32 : i32
    %1 = arith.addi %0, %arg1 : i32
    %c0_i32 = arith.constant 0 : i32
    %2 = arith.minsi %1, %c0_i32 : i32
    %c0_i32_0 = arith.constant 0 : i32
    %c0_i32_1 = arith.constant 0 : i32
    return %2, %c0_i32_0 : i32, i32
  }
  func.func @transform_1(%arg0: i32, %arg1: i32) -> (i32, i32) {
    %c1_i32 = arith.constant 1 : i32
    %0 = arith.muli %arg0, %c1_i32 : i32
    %1 = arith.addi %0, %arg1 : i32
    %c0_i32 = arith.constant 0 : i32
    %2 = arith.minsi %1, %c0_i32 : i32
    %c0_i32_0 = arith.constant 0 : i32
    %c0_i32_1 = arith.constant 0 : i32
    return %2, %c0_i32_0 : i32, i32
  }
  func.func @transform_2(%arg0: i32, %arg1: i32) -> (i32, i32) {
    %c1_i32 = arith.constant 1 : i32
    %0 = arith.muli %arg0, %c1_i32 : i32
    %1 = arith.addi %0, %arg1 : i32
    %c0_i32 = arith.constant 0 : i32
    %2 = arith.minsi %1, %c0_i32 : i32
    %c0_i32_0 = arith.constant 0 : i32
    %c0_i32_1 = arith.constant 0 : i32
    return %2, %c0_i32_0 : i32, i32
  }
  func.func @transform_3(%arg0: i32, %arg1: i32) -> (i32, i32, i32) {
    %c0_i32 = arith.constant 0 : i32
    %c0_i32_0 = arith.constant 0 : i32
    %c0_i32_1 = arith.constant 0 : i32
    return %arg0, %c0_i32, %c0_i32_0 : i32, i32, i32
  }
  func.func @transform_4(%arg0: i32, %arg1: i32) -> (i32, i32, i32) {
    %c0_i32 = arith.constant 0 : i32
    %c0_i32_0 = arith.constant 0 : i32
    %c0_i32_1 = arith.constant 0 : i32
    return %arg0, %c0_i32, %c0_i32_0 : i32, i32, i32
  }
}

</mosaic_0001>

<bundles_post_ra>
// kernel: tpu_custom_call.1
= control target key start
LH: loop header
LB: loop body
LE: loop exit
PB: predicated region body
PF: predicated region fallthrough
CT: control target
= control target key end

     0   :  { %s616_s15 = smov 0   ;;  %s618_s16 = smov 0   ;;  %s680_s0 = inlined_call_operand.vmem [shape: f32[8,32], index: 0, kind: input, shape index: {}]   ;;  %s681_s1 = inlined_call_operand.vmem [shape: s32[8,1], index: 1, kind: input, shape index: {}]   ;;  %s682_s2 = inlined_call_operand.vmem [shape: f32[8,32], index: 2, kind: input, shape index: {}]   ;;  %s683_s3 = inlined_call_operand.vmem [shape: f32[2,1,1], index: 3, kind: output, shape index: {0}]   ;;  %s684_s4 = inlined_call_operand.vmem [shape: f32[2,1,1], index: 4, kind: output, shape index: {1}]  }
   0x1   :  { %s620_s17 = smov 0  }
   0x2 LB: > { %s27_s18 = sadd.s32 1, %s583_s16  ;;  %p512_p0 = scmp.ge.s32.totalorder %s587_s17, 1  ;;  %s587_s17 = sphi %s620_s17, %s15_s17   ;;  %s583_s16 = sphi %s618_s16, %s686_s16   ;;  %s579_s15 = sphi %s616_s15, %s685_s15  }
   0x3   : > { %p29_p1 = scmp.ge.s32.totalorder %s27_s18, 2  ;;  %p230_p2 = scmp.lt.s32.totalorder %s587_s17, 3 }
   0x5   : > { %s688_s18 = smov (%p29_p1, %s27_s18), 0  ;;  %p231_p3 = pnand %p512_p0, %p230_p2 }
   0x6   : > { %p274_p4 = scmp.lt.s32.totalorder (!%p231_p3), %s579_s15, 0  ;;  %v589_v0 = vmov (!%p231_p3), 0   ;;  %vm318_vm0 = vcmask (!%p231_p3), 261120   ;;  %v330_v7 = vlaneseq (!%p231_p3)  ;;  %vm313_vm2 = vcmask (!%p231_p3), 7168   ;;  %s525_s27 = sshll.u32 (!%p231_p3), %s579_s15, 3 }
   0x7   : > { %234 = sbr.rel (%p231_p3) target bundleno = 569 (0x239), region = 32  ;;  %558 = vset.pattern.permute.xlu0 (!%p231_p3), %v589_v0  ;;  %v590_v14 = vmov (!%p231_p3), 0.0   ;;  %vm315_vm3 = vcmask (!%p231_p3), 253952   ;;  %v352_v17 = vstv (!%p231_p3), %s525_s27  ;;  %p303_p5 = scmp.lt.s32.totalorder (!%p231_p3), %s579_s15, 1  ;;  %vm389_vm5 = vcmask (!%p231_p3), 0  }
   0x8   : > { %v331_v8 = vand.u32 (!%p231_p3), 127, %v330_v7  ;;  %314 = vst.msk [vmem:[#allocation2] sm:$0xff] (!%p231_p3), %vm313_vm2, %v590_v14  ;;  %v351_v16 = vshrl.u32 (!%p231_p3), %v330_v7, 7 }
   0x9   : > { %316 = vst.msk [vmem:[#allocation3] sm:$0x1] (!%p231_p3), %vm315_vm3, %v590_v14 }
   0xa   : > { %v353_v20 = vadd.s32 (!%p231_p3), %v352_v17, %v351_v16 }
   0xc   : > { %vm354_vm4 = vcmp.lt.s32.totalorder (!%p231_p3), %v353_v20, 8 }
   0xe   : > { %s275_s19 = scalar_select %p274_p4, %s579_s15, 0 }
   0xf   : > { %v359_v29 = vld [vmem:[#allocation2] sm:$0xff]  ;;  %s692_s15 = smov (!%p303_p5, %s579_s15), 1 }
  0x10   : > { %s690_s19 = smov (!%p274_p4, %s275_s19), 0  ;;  %v363_v40 = vld [vmem:[#allocation3] sm:$0x1]  ;;  %s305_s7 = scalar_lea.vmem %s683_s3, %s692_s15 }
  0x11   : > { %s638_s20 = sshll.u32 %s690_s19, 3  ;;  %s308_s11 = scalar_lea.vmem %s684_s4, %s692_s15 }
  0x12   : > { %s279_s23 = scalar_lea.vmem %s680_s0, %s638_s20  ;;  %s289_s26 = scalar_lea.vmem %s681_s1, %s638_s20 }
  0x13   : > { %v317_v1 = vld [vmem:[%s279_s23] sm:$0xff]  ;;  %s299_s30 = scalar_lea.vmem %s682_s2, %s638_s20 }
  0x14   : > { %v319_v2 = vsel %vm318_vm0, %v317_v1, -inf  ;;  %v332_v3 = vld [vmem:[%s289_s26] sm:$0xff] }
  0x15   : > { %320 = vmax.xlane.f32.xlu0 %v319_v2  ;;  %v345_v19 = vld [vmem:[%s299_s30] sm:$0xff] }
  0x2b   : > { %334 = vperm.xlu0 %558, %v332_v3  }
  0xa2   : > { %v321_v4 = vpop.xlane.xlu0 %320 }
  0xa3   : > { %v322_v5 = vsub.f32 %v317_v1, %v321_v4 }
  0xa5   : > { %v323_v6 = vmul.f32 1.442695, %v322_v5 }
  0xa7   : > { %559 = vpow2.f32 %v323_v6 }
  0xaa   : > { %v335_v9 = vpop.permute.xlu0 %334 }
  0xab   : > { %vm336_vm1 = vcmp.eq.s32.totalorder %v331_v8, %v335_v9 }
  0xac   : > { %v337_v11 = vsel %vm336_vm1, %v317_v1, 0.0 }
  0xad   : > { %v338_v13 = vsel %vm318_vm0, %v337_v11, 0.0 }
  0xb1   : > { %v560_v10 = vpop.eup %559 }
  0xb2   : > { %v325_v12 = vsel %vm318_vm0, %v560_v10, 0.0 }
  0xb3   : > { %326 = vadd.xlane.f32.xlu1 %v325_v12 }
  0xb7   : > { %339 = vadd.xlane.f32.xlu1 %v338_v13 }
 0x140   : > { %v327_v15 = vpop.xlane.xlu1 %326 }
 0x141   : > { %561 = vrcp.f32 %v327_v15 }
 0x142   : > { %563 = vlog2.f32 %v327_v15 }
 0x144   : > { %v340_v25 = vpop.xlane.xlu1 %339 }
 0x14b   : > { %v562_v18 = vpop.eup %561 }
 0x14c   : > { %v564_v21 = vpop.eup %563  ;;  %v329_v22 = vmul.f32 %v562_v18, %v560_v10 }
 0x14d   : > { %v342_v23 = vmul.f32 0.6931472, %v564_v21 }
 0x14e   : > { %v346_v24 = vsub.f32 %v329_v22, %v345_v19 }
 0x14f   : > { %v343_v26 = vadd.f32 %v342_v23, %v321_v4 }
 0x150   : > { %v347_v27 = vmul.f32 %v346_v24, %v346_v24 }
 0x151   : > { %v344_v28 = vsub.f32 %v343_v26, %v340_v25 }
 0x152   : > { %v358_v30 = vsel %vm354_vm4, %v347_v27, 0.0 }
 0x153   : > { %v364_v31 = vsel %vm318_vm0, %v358_v30, 0.0  ;;  %v355_v32 = vsel %vm354_vm4, %v344_v28, 0.0 }
 0x154   : > { %v365_v33 = vrot.slane %v364_v31, 4  ;;  %v360_v34 = vadd.f32 %v359_v29, %v355_v32 }
 0x156   : > { %v366_v35 = vadd.f32 %v365_v33, %v364_v31  ;;  %362 = vst.msk [vmem:[#allocation2] sm:$0xff] %vm313_vm2, %v360_v34 }
 0x158   : > { %v367_v36 = vrot.slane %v366_v35, 2 }
 0x15a   : > { %v368_v37 = vadd.f32 %v367_v36, %v366_v35 }
 0x15c   : > { %v369_v38 = vrot.slane %v368_v37, 1 }
 0x15d   : > { %v377_v39 = vld [vmem:[#allocation2] sm:$0xff] }
 0x15e   : > { %v370_v41 = vadd.f32 %v369_v38, %v368_v37  ;;  %v378_v42 = vsel %vm313_vm2, %v377_v39, 0.0 }
 0x15f   : > { %379 = vadd.xlane.f32.xlu1 %v378_v42 }
 0x160   : > { %v371_v43 = vadd.f32 %v370_v41, %v363_v40 }
 0x162   : > { %373 = vst.msk [vmem:[#allocation3] sm:$0x1] %vm315_vm3, %v371_v43 }
 0x169   : > { %v391_v44 = vld [vmem:[#allocation3] sm:$0x1] }
 0x16a   : > { %v392_v45 = vsel %vm315_vm3, %v391_v44, 0.0 }
 0x16b   : > { %393 = vadd.xlane.f32.xlu1 %v392_v45 }
 0x1ec   : > { %v380_v46 = vpop.xlane.xlu1 %379 }
 0x1ed   : > { %v381_v47 = vrot.slane %v380_v46, 4 }
 0x1ef   : > { %v382_v48 = vadd.f32 %v381_v47, %v380_v46 }
 0x1f1   : > { %v383_v49 = vrot.slane %v382_v48, 2 }
 0x1f3   : > { %v384_v50 = vadd.f32 %v383_v49, %v382_v48 }
 0x1f5   : > { %v385_v51 = vrot.slane %v384_v50, 1 }
 0x1f7   : > { %v386_v52 = vadd.f32 %v385_v51, %v384_v50 }
 0x1f8   : > { %v394_v53 = vpop.xlane.xlu1 %393 }
 0x1f9   : > { %528 = vpush %v386_v52  ;;  %v395_v54 = vrot.slane %v394_v53, 4 }
 0x1fb   : > { %v396_v55 = vadd.f32 %v395_v54, %v394_v53 }
 0x1fd   : > { %v397_v56 = vrot.slane %v396_v55, 2 }
 0x1ff   : > { %v398_v57 = vadd.f32 %v397_v56, %v396_v55 }
 0x201   : > { %v399_v58 = vrot.slane %v398_v57, 1 }
 0x203   : > { %v400_v59 = vadd.f32 %v399_v58, %v398_v57 }
 0x205   : > { %530 = vpush %v400_v59 }
 0x22a   : > { %s529_s8 = spop %528 }
 0x22b   : > { %v388_v60 = vstv %s529_s8 }
 0x22c   : > { %390 = vst.msk [vmem:[%s305_s7] sm:$0x1] %vm389_vm5, %v388_v60 }
 0x236   : > { %s531_s12 = spop %530 }
 0x237   : > { %v402_v61 = vstv %s531_s12 }
 0x238   : > { %403 = vst.msk [vmem:[%s308_s11] sm:$0x1] %vm389_vm5, %v402_v61 }
 0x239 PF: > { %s15_s17 = sadd.s32 1, %s587_s17   ;;  %s685_s15 = smov %s583_s16 }
 0x23a   : > { %p12_p6 = scmp.ge.s32.totalorder %s15_s17, 4   ;;  %s686_s16 = smov %s688_s18 }
 0x23c   :  { %14 = sbr.rel (!%p12_p6) target bundleno = 2 (0x2), region = 88 }

</bundles_post_ra>
